<compile_context>
chip_gen: v7x
topology: tpu7x:2x2x1
jax: 0.10.0
libtpu: 0.0.40
codegen_flags: <defaults>
</compile_context>

<pallas_src>
import numpy as np
import jax
import jax.numpy as jnp
from jax.experimental import pallas as pl
from jax.experimental.pallas import tpu as pltpu


def _round_up(x, m):
    return (x + m - 1) // m * m


def _default_ts_target():
    """Generation-aware lane-tile target (output-position axis of the GEMM)."""
    try:
        kind = jax.devices()[0].device_kind.lower()
    except Exception:
        return 1024
    if "v7" in kind or "7x" in kind:
        return 4096      # 3.2 TB/s HBM: bigger tiles needed to beat per-step overhead
    if "v6" in kind or "6e" in kind:
        return 2048      # ~1.4 TB/s
    return 1024          # v5e and older / unknown


def _conv3d_gemm_kernel(w_ref, x_ref, b_ref, o_ref):
    # w_ref: (Cout, K*Cin)  bf16 weights, taps folded into the contraction dim
    # x_ref: (K*Cin, TS)    bf16 im2col tile; lane axis = output positions (dense)
    # b_ref: (Cout, 1)      f32 bias (separate VPU broadcast-add; not fused in dot)
    # o_ref: (Cout, TS)     f32 lane-dense output tile
    acc = jnp.dot(w_ref[...], x_ref[...], preferred_element_type=jnp.float32)
    o_ref[...] = (acc + b_ref[...]).astype(o_ref.dtype)


def conv3d_pallas(x_ncdhw, weight_oidhw, bias, *, ts_target=None):
    """3D convolution matching nn.Conv3d defaults (stride 1, VALID, bias)."""
    N, Cin, D, H, W = x_ncdhw.shape
    Cout, _, kD, kH, kW = weight_oidhw.shape
    Do, Ho, Wo = D - kD + 1, H - kH + 1, W - kW + 1
    K = kD * kH * kW
    KC = K * Cin
    S = Do * Ho * Wo                       # per-sample output positions (lane axis)

    if ts_target is None:
        ts_target = _default_ts_target()

    # ---- glue (plain JAX): per-sample (K*Cin, S) im2col, in bf16 ------------
    # Row order (cin, kd, kh, kw) matches weight.reshape(Cout, Cin*kD*kH*kW).
    xb = x_ncdhw.astype(jnp.bfloat16)
    taps = []
    for kd in range(kD):
        for kh in range(kH):
            for kw in range(kW):
                sl = xb[:, :, kd:kd + Do, kh:kh + Ho, kw:kw + Wo]  # (N,Cin,Do,Ho,Wo)
                taps.append(sl.reshape(N, Cin, S))
    xs = jnp.stack(taps, axis=2).reshape(N, KC, S)                 # (N, K*Cin, S)

    w2 = weight_oidhw.reshape(Cout, KC).astype(jnp.bfloat16)       # (Cout, K*Cin)
    b2 = bias.reshape(Cout, 1).astype(jnp.float32)                 # (Cout, 1)

    # ---- lane tiling of the per-sample spatial axis (multiple of 128) -------
    if S <= ts_target:
        TS = _round_up(S, 128)
    else:
        TS = ts_target                     # multiple of 128 by construction
    Sp = _round_up(S, TS)
    if Sp != S:
        xs = jnp.pad(xs, ((0, 0), (0, 0), (0, Sp - S)))
    grid_s = Sp // TS

    cost = pl.CostEstimate(
        flops=2 * N * S * KC * Cout,
        transcendentals=0,
        bytes_accessed=(xs.size * 2 + w2.size * 2 + b2.size * 4
                        + N * Cout * Sp * 4),
    )

    out = pl.pallas_call(
        _conv3d_gemm_kernel,
        out_shape=jax.ShapeDtypeStruct((N, Cout, Sp), jnp.float32),
        grid=(N, grid_s),
        in_specs=[
            pl.BlockSpec((Cout, KC), lambda n, s: (0, 0)),          # weights (resident)
            pl.BlockSpec((None, KC, TS), lambda n, s: (n, 0, s)),   # im2col tile (n squeezed)
            pl.BlockSpec((Cout, 1), lambda n, s: (0, 0)),           # bias
        ],
        out_specs=pl.BlockSpec((None, Cout, TS), lambda n, s: (n, 0, s)),
        compiler_params=pltpu.CompilerParams(
            dimension_semantics=("parallel", "parallel"),
            vmem_limit_bytes=32 * 1024 * 1024,
        ),
        cost_estimate=cost,
    )(w2, xs, b2)

    # Already in PyTorch (N, Cout, spatial) layout: drop lane padding, reshape.
    return out[:, :, :S].reshape(N, Cout, Do, Ho, Wo)


if __name__ == "__main__":
    # Decoder3d(in_channels=4, out_channels=8, kernel_size=3)
    N, Cin, Cout = 2, 4, 8
    D = H = W = 8
    kD = kH = kW = 3

    key = jax.random.PRNGKey(0)
    k_w, k_b, k_x = jax.random.split(key, 3)

    # Deterministic init, same scheme as PyTorch Conv3d default (+-1/sqrt(fan_in))
    fan_in = Cin * kD * kH * kW
    bound = 1.0 / float(np.sqrt(fan_in))
    weight = jax.random.uniform(k_w, (Cout, Cin, kD, kH, kW), jnp.float32,
                                minval=-bound, maxval=bound)
    bias = jax.random.uniform(k_b, (Cout,), jnp.float32,
                              minval=-bound, maxval=bound)
    x = jax.random.normal(k_x, (N, Cin, D, H, W), dtype=jnp.float32)

    out = conv3d_pallas(x, weight, bias)
    out = jax.block_until_ready(out)

    # Reference (pure XLA, f32) check of the Conv3d forward semantics.
    ref = jax.lax.conv_general_dilated(
        x, weight, window_strides=(1, 1, 1), padding="VALID",
        dimension_numbers=("NCDHW", "OIDHW", "NCDHW"))
    ref = ref + bias.reshape(1, Cout, 1, 1, 1)
    ref = jax.block_until_ready(ref)

    assert out.shape == (N, Cout, D - kD + 1, H - kH + 1, W - kW + 1), out.shape
    # bf16 transport of xs / weights -> loosened tolerance (per perf review).
    np.testing.assert_allclose(np.asarray(out), np.asarray(ref),
                               rtol=3e-2, atol=3e-2)
    print("KERNEL_OK")
</pallas_src>

<mosaic_0001>
module attributes {stable_mosaic.version = 11 : i64} {
  func.func @_conv3d_gemm_kernel(%arg0: i32, %arg1: i32, %arg2: memref<8x108xbf16, #tpu.memory_space<vmem>>, %arg3: memref<1x108x256xbf16, #tpu.memory_space<vmem>>, %arg4: memref<8x1xf32, #tpu.memory_space<vmem>>, %arg5: memref<1x8x256xf32, #tpu.memory_space<vmem>>) attributes {dimension_semantics = [#tpu.dimension_semantics<parallel>, #tpu.dimension_semantics<parallel>], iteration_bounds = array<i64: 2, 1>, scalar_prefetch = 0 : i64, scratch_operands = 0 : i64, tpu.core_type = #tpu.core_type<tc>, window_params = [{pipeline_mode = #tpu.pipeline_mode<synchronous>, transform_indices = @transform_0, window_bounds = array<i64: 8, 108>}, {transform_indices = @transform_1, window_bounds = array<i64: 1, 108, 256>}, {pipeline_mode = #tpu.pipeline_mode<synchronous>, transform_indices = @transform_2, window_bounds = array<i64: 8, 1>}, {transform_indices = @transform_3, window_bounds = array<i64: 1, 8, 256>}]} {
    %c0 = arith.constant 0 : index
    %c0_0 = arith.constant 0 : index
    %0 = vector.load %arg2[%c0, %c0_0] : memref<8x108xbf16, #tpu.memory_space<vmem>>, vector<8x108xbf16>
    %c0_1 = arith.constant 0 : index
    %c0_2 = arith.constant 0 : index
    %c0_3 = arith.constant 0 : index
    %1 = vector.load %arg3[%c0_1, %c0_2, %c0_3] : memref<1x108x256xbf16, #tpu.memory_space<vmem>>, vector<1x108x256xbf16>
    %2 = vector.shape_cast %1 : vector<1x108x256xbf16> to vector<108x256xbf16>
    %cst = arith.constant dense<0.000000e+00> : vector<8x256xf32>
    %3 = tpu.matmul %0, %2, %cst {dimension_numbers = #tpu.dot_dimension_numbers<[1], [0], [0], [1], [0, 0, 1, 1], [], []>} : vector<8x108xbf16>, vector<108x256xbf16>, vector<8x256xf32> -> vector<8x256xf32>
    %c0_4 = arith.constant 0 : index
    %c0_5 = arith.constant 0 : index
    %4 = vector.load %arg4[%c0_4, %c0_5] : memref<8x1xf32, #tpu.memory_space<vmem>>, vector<8x1xf32>
    %5 = vector.broadcast %4 : vector<8x1xf32> to vector<8x256xf32>
    %6 = arith.addf %3, %5 : vector<8x256xf32>
    %c0_6 = arith.constant 0 : index
    %c0_7 = arith.constant 0 : index
    %c0_8 = arith.constant 0 : index
    %7 = vector.load %arg5[%c0_6, %c0_7, %c0_8] : memref<1x8x256xf32, #tpu.memory_space<vmem>>, vector<1x8x256xf32>
    %8 = vector.shape_cast %7 : vector<1x8x256xf32> to vector<8x256xf32>
    %9 = vector.shape_cast %6 : vector<8x256xf32> to vector<1x8x256xf32>
    tpu.vector_store %arg5[%c0_6, %c0_7, %c0_8], %9 {strides = array<i32>} : memref<1x8x256xf32, #tpu.memory_space<vmem>>, vector<1x8x256xf32>,
    return
  }
  func.func @transform_0(%arg0: i32, %arg1: i32) -> (i32, i32) {
    %c0_i32 = arith.constant 0 : i32
    %c0_i32_0 = arith.constant 0 : i32
    %c0_i32_1 = arith.constant 0 : i32
    return %c0_i32, %c0_i32_0 : i32, i32
  }
  func.func @transform_1(%arg0: i32, %arg1: i32) -> (i32, i32, i32) {
    %c0_i32 = arith.constant 0 : i32
    %c0_i32_0 = arith.constant 0 : i32
    return %arg0, %c0_i32, %arg1 : i32, i32, i32
  }
  func.func @transform_2(%arg0: i32, %arg1: i32) -> (i32, i32) {
    %c0_i32 = arith.constant 0 : i32
    %c0_i32_0 = arith.constant 0 : i32
    %c0_i32_1 = arith.constant 0 : i32
    return %c0_i32, %c0_i32_0 : i32, i32
  }
  func.func @transform_3(%arg0: i32, %arg1: i32) -> (i32, i32, i32) {
    %c0_i32 = arith.constant 0 : i32
    %c0_i32_0 = arith.constant 0 : i32
    return %arg0, %c0_i32, %arg1 : i32, i32, i32
  }
}

</mosaic_0001>

<bundles_post_ra>
// kernel: tpu_custom_call.1
= control target key start
LH: loop header
LB: loop body
LE: loop exit
PB: predicated region body
PF: predicated region fallthrough
CT: control target
= control target key end

     0   :  { %8 = vsyncpa [#allocation3], 0  ;;  %s765_s0 = inlined_call_operand.vmem [shape: bf16[8,108], index: 0, kind: input, shape index: {}]   ;;  %s766_s1 = inlined_call_operand.vmem [shape: bf16[2,108,256], index: 1, kind: input, shape index: {}]   ;;  %s767_s2 = inlined_call_operand.vmem [shape: f32[8,1], index: 2, kind: input, shape index: {}]   ;;  %s768_s3 = inlined_call_operand.hbm [shape: f32[2,8,256], index: 3, kind: output, shape index: {}]  }
   0x1   :  { %10 = vsyncpa [#allocation3 + $0x1], 0  ;;  %s647_s12 = smov 0   ;;  %s649_s13 = smov 0  }
   0x2   :  { %s651_s14 = smov 0   ;;  %s653_s15 = smov 0  }
   0x3   :  { %s655_s16 = smov 0   ;;  %s657_s17 = smov 0  }
   0x4 LB: > { %s437_s18 = sadd.s32 4294967295, %s623_s17   ;;  %s438_s19 = sadd.s32 4294967294, %s623_s17   ;;  %s623_s17 = sphi %s657_s17, %s16_s17   ;;  %s619_s16 = sphi %s655_s16, %s775_s16   ;;  %s615_s15 = sphi %s653_s15, %s774_s15   ;;  %s611_s14 = sphi %s651_s14, %s773_s14   ;;  %s607_s13 = sphi %s649_s13, %s772_s13   ;;  %s603_s12 = sphi %s647_s12, %s771_s12  }
   0x5   : > { %s28_s20 = sadd.s32 1, %s619_s16  ;;  %s107_s21 = sadd.s32 1, %s611_s14 }
   0x6   : > { %p30_p0 = scmp.ge.s32.totalorder %s28_s20, 2  ;;  %p117_p1 = scmp.ne.s32.totalorder %s611_s14, %s607_s13 }
   0x7   : > { %p118_p2 = scmp.eq.s32.totalorder %s437_s18, 1  ;;  %p123_p3 = scmp.ne.s32.totalorder %s607_s13, %s603_s12 }
   0x8   : > { %s777_s20 = smov (%p30_p0, %s28_s20), 0  ;;  %p124_p5 = scmp.eq.s32.totalorder %s438_s19, 1 }
   0x9   : > { %p687_p4 = por %p118_p2, %p117_p1  ;;  %s102_s23 = ssub.s32 %s619_s16, %s777_s20 }
   0xa   : > { %p441_p6 = scmp.ge.s32.totalorder %s623_s17, 1  ;;  %p105_p7 = scmp.eq.s32.totalorder %s102_s23, 0 }
   0xb   : > { %p694_p8 = por %p124_p5, %p123_p3  ;;  %p161_p9 = scmp.lt.s32.totalorder %s623_s17, 3 }
   0xc   : > { %s700_s25 = scalar_select %p105_p7, %s611_s14, %s107_s21  }
   0xd   : > { %p162_p10 = pnand %p441_p6, %p161_p9 }
   0xe   : > { %p190_p11 = scmp.lt.s32.totalorder (!%p162_p10), %s615_s15, 1  ;;  %v625_v0 = vmov (!%p162_p10), 0   ;;  %v216_v1 = vld [vmem:[%s767_s2] sm:$0xff] (!%p162_p10)  ;;  %vm294_vm0 = vcmask (!%p162_p10), 1045504   ;;  %vm290_vm1 = vcmask (!%p162_p10), 883712   ;;  %s186_s8 = sand.u32 (!%p162_p10), 1, %s607_s13  }
   0xf   : > { %165 = sbr.rel (%p162_p10) target bundleno = 285 (0x11d), region = 32  ;;  %333 = vmatprep.mubr.bf16.mxu0 (!%p162_p10), %v625_v0  ;;  %523 = vset.pattern.permute.xlu0 (!%p162_p10), %v625_v0  ;;  %v201_v17 = vld [vmem:[%s765_s0] sm:$0xf] (!%p162_p10)  ;;  %s442_s9 = sshll.u32 (!%p162_p10), %s186_s8, 4 }
  0x10   : > { %219 = vperm.xlu0 (!%p162_p10), %523, %v216_v1   ;;  %s465_s10 = sshll.u32 (!%p162_p10), %s615_s15, 8  ;;  %s188_s11 = scalar_lea.vmem (!%p162_p10), [#allocation2], %s442_s9 }
  0x11   : > { %s361_s18 = sshll.u32 (!%p162_p10), %s188_s11, 4  ;;  %s718_s23 = scalar_lea.hbm (!%p162_p10), %s768_s3, %s465_s10  ;;  %s720_s18 = int_to_ptr.vmem [resolvable:$true] %s361_s18 }
  0x12   : > { %s545_s26 = scalar_lea.vmem (!%p162_p10), %s720_s18, 256  ;;  %s626_s27 = smov (!%p162_p10), [#allocation2]  }
  0x13   : > { %p546_p12 = scmp.ne.s32.totalorder (!%p162_p10), %s720_s18, %s545_s26 }
  0x15   : > { %p547_p13 = pnand (!%p162_p10), %p546_p12, %p687_p4 }
  0x16   : > { %s191_s28 = scalar_select %p190_p11, %s615_s15, 1 }
  0x17   : > { %s345_s15 = scalar_lea.sflag [#allocation3], %s186_s8  ;;  %p548_p0 = pneg %p547_p13 }
  0x18   : > { %s466_s29 = smul.u32 112, %s191_s28  ;;  %s549_s28 = sshll.u32 %s626_s27, 4  ;;  %s550_s28 = int_to_ptr.vmem [resolvable:$false] %s549_s28 }
  0x19   : > { %p552_p1 = scmp.lt.s32.totalorder %s720_s18, %s550_s28 }
  0x1a   : > { %s197_s5 = scalar_lea.vmem %s766_s1, %s466_s29  ;;  %s551_s29 = scalar_lea.vmem %s550_s28, 512 }
  0x1b   : > { %v524_v2 = vld [vmem:[%s197_s5 + $0x4] ss:$8 sps:$4 sm:$0xff]   ;;  %v526_v3 = vld [vmem:[%s197_s5] ss:$8 sps:$4 sm:$0xff]   ;;  %v527_v4 = vld [vmem:[%s197_s5 + $0x14] ss:$8 sps:$4 sm:$0xff]   ;;  %p553_p2 = scmp.lt.s32.totalorder %s551_s29, %s545_s26 }
  0x1c   : > { %301 = vmatprep.subr.bf16.mxu0 %v524_v2  ;;  %v529_v5 = vld [vmem:[%s197_s5 + $0x10] ss:$8 sps:$4 sm:$0xff]   ;;  %v530_v6 = vld [vmem:[%s197_s5 + $0x24] ss:$8 sps:$4 sm:$0xff]   ;;  %v532_v7 = vld [vmem:[%s197_s5 + $0x20] ss:$8 sps:$4 sm:$0xff]  }
  0x1d   : > { %302 = vmatpush1.bf16.msra.mxu0 %v526_v3  ;;  %v533_v8 = vld [vmem:[%s197_s5 + $0x34] ss:$8 sps:$4 sm:$0xff]   ;;  %v535_v9 = vld [vmem:[%s197_s5 + $0x30] ss:$8 sps:$4 sm:$0xff]   ;;  %v536_v10 = vld [vmem:[%s197_s5 + $0x44] ss:$8 sps:$4 sm:$0xff]   ;;  %p554_p3 = por %p553_p2, %p552_p1 }
  0x1e   : > { %303 = vmatprep.subr.bf16.mxu0 %v527_v4  ;;  %v538_v11 = vld [vmem:[%s197_s5 + $0x40] ss:$8 sps:$4 sm:$0xff]   ;;  %v539_v12 = vld [vmem:[%s197_s5 + $0x54] ss:$8 sps:$4 sm:$0xff]   ;;  %v541_v13 = vld [vmem:[%s197_s5 + $0x50] ss:$8 sps:$4 sm:$0xff]  }
  0x1f   : > { %v542_v14 = vld [vmem:[%s197_s5 + $0x64] ss:$8 sps:$4 sm:$0x3f]   ;;  %v544_v15 = vld [vmem:[%s197_s5 + $0x60] ss:$8 sps:$4 sm:$0x3f]   ;;  %p555_p5 = pnand %p554_p3, %p548_p0 }
  0x20   : > { %v296_v16 = vsel %vm294_vm0, %v544_v15, 0 }
  0x21   : > { %304 = vmatpush1.bf16.msra.mxu0 %v529_v5 }
  0x22   : > { %305 = vmatprep.subr.bf16.mxu0 %v530_v6 }
  0x25   : > { %306 = vmatpush1.bf16.msra.mxu0 %v532_v7 }
  0x26   : > { %307 = vmatprep.subr.bf16.mxu0 %v533_v8 }
  0x29   : > { %308 = vmatpush1.bf16.msra.mxu0 %v535_v9 }
  0x2a   : > { %309 = vmatprep.subr.bf16.mxu0 %v536_v10 }
  0x2d   : > { %310 = vmatpush1.bf16.msra.mxu0 %v538_v11 }
  0x2e   : > { %311 = vmatprep.subr.bf16.mxu0 %v539_v12 }
  0x31   : > { %312 = vmatpush1.bf16.msra.mxu0 %v541_v13 }
  0x32   : > { %458 = vmatprep.subr.msk.bf16.mxu0 %vm294_vm0, %v542_v14 }
  0x35   : > { %314 = vmatpush1.bf16.msra.mxu0 %v296_v16 }
  0x38   : > { %459 = vmatmul.mubr.msk.bf16.vlgmr.msra.gmra.mrb[0].mxu0 %vm290_vm1, %v201_v17 }
  0x8f   : > { %v220_v18 = vpop.permute.xlu0 %219 }
 0x10b   : > { %v335_v19 = vpop.f32.mrb[0].mxu0 }
 0x10c   : > { %v336_v20 = vadd.f32 %v335_v19, %v220_v18  ;;  %v337_v21 = vpop.f32.mrb[1].mxu0 }
 0x10d   : > { %v338_v22 = vadd.f32 %v337_v21, %v220_v18  ;;  %v339_v23 = vpop.f32.mrb[2].mxu0 }
 0x10e   : > { %342 = vst [vmem:[%s188_s11] sm:$0xff] %v336_v20  ;;  %v340_v24 = vpop.f32.mrb[3].mxu0 }
 0x10f   : > { %343 = vst [vmem:[%s188_s11 + $0x8] sm:$0xff] %v338_v22 }
 0x110   : > { %558 = shalt.err (!%p555_p5)
}
 0x111   : > { %s559_s30 = scalar_lea.hbm %s718_s23, 256  ;;  %s563_s6 = scalar_lea.hbm %s768_s3, 512 }
 0x112   : > { %p560_p6 = scmp.ne.s32.totalorder %s718_s23, %s559_s30  ;;  %p564_p10 = scmp.lt.u32.totalorder %s718_s23, %s768_s3 }
 0x113   : > { %p565_p11 = scmp.lt.u32.totalorder %s563_s6, %s559_s30  ;;  %p567_p13 = scmp.lt.u32.totalorder %s559_s30, %s718_s23 }
 0x114   : > { %p561_p7 = pnand %p560_p6, %p687_p4 }
 0x115   : > { %p566_p12 = por %p565_p11, %p564_p10 }
 0x116   : > { %p562_p9 = pneg %p561_p7 }
 0x117   : > { %p568_p0 = por %p567_p13, %p566_p12 }
 0x119   : > { %p569_p1 = pnand %p568_p0, %p562_p9 }
 0x11b   : > { %572 = shalt.err (!%p569_p1)
}
 0x11c   : > { %467 = dma.vmem_to_hbm [thread:$0]  (%p687_p4), %s720_s18, 256, %s718_s23, %s345_s15  }
 0x11d PF: > { %p473_p2 = scmp.ge.s32.totalorder %s623_s17, 2  ;;  %s373_s9 = sand.u32 1, %s603_s12  }
 0x11e   : > { %s374_s10 = scalar_lea.sflag [#allocation3], %s373_s9 }
 0x11f   : > { %p470_p3 = pnand %p473_p2, %p694_p8 }
 0x121   : > { %598 = dma.done.wait (!%p470_p3), %s374_s10, 256  }
 0x122   : > { %600 = vsyncadd (!%p470_p3), %s374_s10, 4294967040  ;;  %s16_s17 = sadd.s32 1, %s623_s17   ;;  %s771_s12 = smov %s607_s13 }
 0x123   : > { %p13_p5 = scmp.ge.s32.totalorder %s16_s17, 4   ;;  %s772_s13 = smov %s611_s14 }
 0x124   : > { %s773_s14 = smov %s700_s25  ;;  %s774_s15 = smov %s619_s16 }
 0x125   : > { %s775_s16 = smov %s777_s20  ;;  %15 = sbr.rel (!%p13_p5) target bundleno = 4 (0x4), region = 67 }
 0x12c   :  { %379 = vsyncpa [#allocation3], 1 }
 0x12d   :  { %381 = vsyncpa [#allocation3 + $0x1], 1 }

</bundles_post_ra>
